<compile_context>
chip_gen: v6e
topology: v6e:2x2x1
jax: 0.10.0
libtpu: 0.0.40
codegen_flags: <defaults>
</compile_context>

<pallas_src>
import jax
import jax.numpy as jnp
from jax.experimental import pallas as pl
from jax.experimental.pallas import tpu as pltpu


# ----------------------------------------------------------------------------- kernel
def vae_kernel(x_ref, eps_ref,
               we1_ref, be1_ref, wmv_ref, bmv_ref,
               wd1_ref, bd1_ref, wd2_ref, bd2_ref,
               pred_ref, muvar_ref):
    # x_ref: [TB, D_in] bf16, eps_ref: [TB, Z_P] f32, weights bf16, biases f32.
    x = x_ref[...]

    # ----- encoder layer 1 (bf16 MXU, f32 accumulate / elementwise) -----
    h = jnp.dot(x, we1_ref[...], preferred_element_type=jnp.float32) + be1_ref[...]
    h = jnp.maximum(h, 0.0)

    # ----- fused mu/logvar head: one [HID_P, 2*Z_P] matmul -----
    muvar = jnp.dot(h.astype(jnp.bfloat16), wmv_ref[...],
                    preferred_element_type=jnp.float32) + bmv_ref[...]
    z_p = wmv_ref.shape[1] // 2          # 128-lane aligned static split
    mu = muvar[:, :z_p]
    logvar = muvar[:, z_p:]

    # ----- reparameterization: z = eps * exp(logvar/2) + mu  (f32) -----
    std = jnp.exp(logvar * 0.5)
    z = eps_ref[...] * std + mu

    # ----- decoder -----
    hd = jnp.dot(z.astype(jnp.bfloat16), wd1_ref[...],
                 preferred_element_type=jnp.float32) + bd1_ref[...]
    hd = jnp.maximum(hd, 0.0)
    logits = jnp.dot(hd.astype(jnp.bfloat16), wd2_ref[...],
                     preferred_element_type=jnp.float32) + bd2_ref[...]

    pred_ref[...] = jax.nn.sigmoid(logits)
    muvar_ref[...] = muvar               # lane-dense [TB, 2*Z_P] (split in wrapper)


# ----------------------------------------------------------------------------- helpers
def _round_up(n, m):
    return ((n + m - 1) // m) * m


def _pad2d(a, rows, cols):
    return jnp.pad(a, ((0, rows - a.shape[0]), (0, cols - a.shape[1])))


# ----------------------------------------------------------------------------- wrapper
def vae_forward(x, eps, params, *, tile_b=None):
    (we1, be1, wmu, bmu, wvar, bvar, wd1, bd1, wd2, bd2) = params
    B, D_in = x.shape
    HID = we1.shape[1]
    Z = wmu.shape[1]
    D_out = wd2.shape[1]

    LANE = 128
    D_in_p = _round_up(D_in, LANE)
    D_out_p = _round_up(D_out, LANE)
    HID_p = _round_up(HID, LANE)
    Z_p = _round_up(Z, LANE)

    # Batch tile: multiple of 16 (bf16 sublane pack), capped so double-buffered
    # activation tiles stay well under v7x's 64 MiB VMEM.
    if tile_b is None:
        tile_b = min(512, _round_up(B, 16))
    B_pad = _round_up(B, tile_b)

    # ---- pad + pack parameters (matmul operands bf16, biases f32) ----
    we1_p = _pad2d(we1, D_in_p, HID_p).astype(jnp.bfloat16)
    be1_p = _pad2d(be1, 1, HID_p).astype(jnp.float32)

    wmv = jnp.zeros((HID_p, 2 * Z_p), jnp.float32)
    wmv = wmv.at[:HID, :Z].set(wmu).at[:HID, Z_p:Z_p + Z].set(wvar)
    wmv_p = wmv.astype(jnp.bfloat16)
    bmv_p = jnp.zeros((1, 2 * Z_p), jnp.float32)
    bmv_p = bmv_p.at[:, :Z].set(bmu).at[:, Z_p:Z_p + Z].set(bvar)

    wd1_p = _pad2d(wd1, Z_p, HID_p).astype(jnp.bfloat16)
    bd1_p = _pad2d(bd1, 1, HID_p).astype(jnp.float32)
    wd2_p = _pad2d(wd2, HID_p, D_out_p).astype(jnp.bfloat16)
    bd2_p = _pad2d(bd2, 1, D_out_p).astype(jnp.float32)

    x_p = _pad2d(x, B_pad, D_in_p).astype(jnp.bfloat16)
    eps_p = _pad2d(eps, B_pad, Z_p).astype(jnp.float32)

    grid = (B_pad // tile_b,)

    def batch_spec(cols):
        return pl.BlockSpec((tile_b, cols), lambda i: (i, 0))

    def resident(arr):
        # Constant index_map -> weight stays VMEM-resident across batch tiles.
        return pl.BlockSpec(arr.shape, lambda i: (0, 0))

    pred_p, muvar_p = pl.pallas_call(
        vae_kernel,
        out_shape=(
            jax.ShapeDtypeStruct((B_pad, D_out_p), jnp.float32),   # predicted
            jax.ShapeDtypeStruct((B_pad, 2 * Z_p), jnp.float32),   # [mu | logvar]
        ),
        grid=grid,
        in_specs=[
            batch_spec(D_in_p),          # x
            batch_spec(Z_p),             # eps
            resident(we1_p), resident(be1_p),
            resident(wmv_p), resident(bmv_p),
            resident(wd1_p), resident(bd1_p),
            resident(wd2_p), resident(bd2_p),
        ],
        out_specs=(batch_spec(D_out_p), batch_spec(2 * Z_p)),
        compiler_params=pltpu.CompilerParams(
            dimension_semantics=("parallel",),       # shard batch tiles across TCs (v7x)
            vmem_limit_bytes=48 << 20,               # fits all generations incl. v7x
        ),
    )(x_p, eps_p, we1_p, be1_p, wmv_p, bmv_p, wd1_p, bd1_p, wd2_p, bd2_p)

    pred = pred_p[:B, :D_out]
    z_mu = muvar_p[:B, :Z]
    z_var = muvar_p[:B, Z_p:Z_p + Z]     # log-variance, matching the reference
    return pred, z_mu, z_var


# ----------------------------------------------------------------------------- params / reference
def init_params(key, d_in, hidden, latent, d_out):
    ks = jax.random.split(key, 5)
    scale = 0.05
    we1 = scale * jax.random.normal(ks[0], (d_in, hidden), jnp.float32)
    be1 = jnp.zeros((1, hidden), jnp.float32)
    wmu = scale * jax.random.normal(ks[1], (hidden, latent), jnp.float32)
    bmu = jnp.zeros((1, latent), jnp.float32)
    wvar = scale * jax.random.normal(ks[2], (hidden, latent), jnp.float32)
    bvar = jnp.zeros((1, latent), jnp.float32)
    wd1 = scale * jax.random.normal(ks[3], (latent, hidden), jnp.float32)
    bd1 = jnp.zeros((1, hidden), jnp.float32)
    wd2 = scale * jax.random.normal(ks[4], (hidden, d_out), jnp.float32)
    bd2 = jnp.zeros((1, d_out), jnp.float32)
    return (we1, be1, wmu, bmu, wvar, bvar, wd1, bd1, wd2, bd2)


def vae_reference(x, eps, params):
    # Pure-JAX f32 reference for correctness checking.
    (we1, be1, wmu, bmu, wvar, bvar, wd1, bd1, wd2, bd2) = params
    h = jnp.maximum(x @ we1 + be1, 0.0)
    mu = h @ wmu + bmu
    logvar = h @ wvar + bvar
    z = eps * jnp.exp(logvar / 2) + mu
    hd = jnp.maximum(z @ wd1 + bd1, 0.0)
    pred = jax.nn.sigmoid(hd @ wd2 + bd2)
    return pred, mu, logvar


# ----------------------------------------------------------------------------- main
if __name__ == "__main__":
    key = jax.random.PRNGKey(0)
    k_x, k_eps, k_p = jax.random.split(key, 3)

    B, C, H, W = 2, 4, 16, 16          # small NCHW-style input
    D_in = C * H * W                   # 1024 flattened features
    HID, Z = 32, 16
    D_out = D_in

    x_img = jax.random.normal(k_x, (B, C, H, W), jnp.float32)
    x = x_img.reshape(B, D_in)                       # layout: [B, D_in]
    # eps plays the role of torch.randn_like(std); drawn deterministically here.
    eps = jax.random.normal(k_eps, (B, Z), jnp.float32)

    params = init_params(k_p, D_in, HID, Z, D_out)

    pred, z_mu, z_var = vae_forward(x, eps, params)
    jax.block_until_ready((pred, z_mu, z_var))

    # sanity check vs pure-JAX f32 reference (kernel matmuls are bf16 -> looser tol)
    pred_r, mu_r, var_r = vae_reference(x, eps, params)
    assert pred.shape == (B, D_out) and z_mu.shape == (B, Z) and z_var.shape == (B, Z)
    assert jnp.allclose(pred, pred_r, atol=5e-2, rtol=5e-2)
    assert jnp.allclose(z_mu, mu_r, atol=5e-2, rtol=5e-2)
    assert jnp.allclose(z_var, var_r, atol=5e-2, rtol=5e-2)

    print("KERNEL_OK")
</pallas_src>

<mosaic_0001>
module attributes {stable_mosaic.version = 11 : i64} {
  func.func @vae_kernel(%arg0: i32, %arg1: memref<16x1024xbf16, #tpu.memory_space<vmem>>, %arg2: memref<16x128xf32, #tpu.memory_space<vmem>>, %arg3: memref<1024x128xbf16, #tpu.memory_space<vmem>>, %arg4: memref<1x128xf32, #tpu.memory_space<vmem>>, %arg5: memref<128x256xbf16, #tpu.memory_space<vmem>>, %arg6: memref<1x256xf32, #tpu.memory_space<vmem>>, %arg7: memref<128x128xbf16, #tpu.memory_space<vmem>>, %arg8: memref<1x128xf32, #tpu.memory_space<vmem>>, %arg9: memref<128x1024xbf16, #tpu.memory_space<vmem>>, %arg10: memref<1x1024xf32, #tpu.memory_space<vmem>>, %arg11: memref<16x1024xf32, #tpu.memory_space<vmem>>, %arg12: memref<16x256xf32, #tpu.memory_space<vmem>>) attributes {dimension_semantics = [#tpu.dimension_semantics<parallel>], iteration_bounds = array<i64: 1>, scalar_prefetch = 0 : i64, scratch_operands = 0 : i64, tpu.core_type = #tpu.core_type<tc>, window_params = [{transform_indices = @transform_0, window_bounds = array<i64: 16, 1024>}, {transform_indices = @transform_1, window_bounds = array<i64: 16, 128>}, {pipeline_mode = #tpu.pipeline_mode<synchronous>, transform_indices = @transform_2, window_bounds = array<i64: 1024, 128>}, {pipeline_mode = #tpu.pipeline_mode<synchronous>, transform_indices = @transform_3, window_bounds = array<i64: 1, 128>}, {pipeline_mode = #tpu.pipeline_mode<synchronous>, transform_indices = @transform_4, window_bounds = array<i64: 128, 256>}, {pipeline_mode = #tpu.pipeline_mode<synchronous>, transform_indices = @transform_5, window_bounds = array<i64: 1, 256>}, {pipeline_mode = #tpu.pipeline_mode<synchronous>, transform_indices = @transform_6, window_bounds = array<i64: 128, 128>}, {pipeline_mode = #tpu.pipeline_mode<synchronous>, transform_indices = @transform_7, window_bounds = array<i64: 1, 128>}, {pipeline_mode = #tpu.pipeline_mode<synchronous>, transform_indices = @transform_8, window_bounds = array<i64: 128, 1024>}, {pipeline_mode = #tpu.pipeline_mode<synchronous>, transform_indices = @transform_9, window_bounds = array<i64: 1, 1024>}, {transform_indices = @transform_10, window_bounds = array<i64: 16, 1024>}, {transform_indices = @transform_11, window_bounds = array<i64: 16, 256>}]} {
    %c0 = arith.constant 0 : index
    %c0_0 = arith.constant 0 : index
    %0 = vector.load %arg1[%c0, %c0_0] : memref<16x1024xbf16, #tpu.memory_space<vmem>>, vector<16x1024xbf16>
    %c0_1 = arith.constant 0 : index
    %c0_2 = arith.constant 0 : index
    %1 = vector.load %arg3[%c0_1, %c0_2] : memref<1024x128xbf16, #tpu.memory_space<vmem>>, vector<1024x128xbf16>
    %cst = arith.constant dense<0.000000e+00> : vector<16x128xf32>
    %2 = tpu.matmul %0, %1, %cst {dimension_numbers = #tpu.dot_dimension_numbers<[1], [0], [0], [1], [0, 0, 1, 1], [], []>} : vector<16x1024xbf16>, vector<1024x128xbf16>, vector<16x128xf32> -> vector<16x128xf32>
    %c0_3 = arith.constant 0 : index
    %c0_4 = arith.constant 0 : index
    %3 = vector.load %arg4[%c0_3, %c0_4] : memref<1x128xf32, #tpu.memory_space<vmem>>, vector<1x128xf32>
    %4 = vector.broadcast %3 : vector<1x128xf32> to vector<16x128xf32>
    %5 = arith.addf %2, %4 : vector<16x128xf32>
    %cst_5 = arith.constant 0.000000e+00 : f32
    %6 = vector.broadcast %cst_5 : f32 to vector<16x128xf32>
    %7 = arith.maximumf %5, %6 : vector<16x128xf32>
    %8 = arith.truncf %7 : vector<16x128xf32> to vector<16x128xbf16>
    %c0_6 = arith.constant 0 : index
    %c0_7 = arith.constant 0 : index
    %9 = vector.load %arg5[%c0_6, %c0_7] : memref<128x256xbf16, #tpu.memory_space<vmem>>, vector<128x256xbf16>
    %cst_8 = arith.constant dense<0.000000e+00> : vector<16x256xf32>
    %10 = tpu.matmul %8, %9, %cst_8 {dimension_numbers = #tpu.dot_dimension_numbers<[1], [0], [0], [1], [0, 0, 1, 1], [], []>} : vector<16x128xbf16>, vector<128x256xbf16>, vector<16x256xf32> -> vector<16x256xf32>
    %c0_9 = arith.constant 0 : index
    %c0_10 = arith.constant 0 : index
    %11 = vector.load %arg6[%c0_9, %c0_10] : memref<1x256xf32, #tpu.memory_space<vmem>>, vector<1x256xf32>
    %12 = vector.broadcast %11 : vector<1x256xf32> to vector<16x256xf32>
    %13 = arith.addf %10, %12 : vector<16x256xf32>
    %14 = vector.extract_strided_slice %13 {offsets = [0, 0], sizes = [16, 128], strides = [1, 1]} : vector<16x256xf32> to vector<16x128xf32>
    %15 = vector.extract_strided_slice %13 {offsets = [0, 128], sizes = [16, 128], strides = [1, 1]} : vector<16x256xf32> to vector<16x128xf32>
    %cst_11 = arith.constant 5.000000e-01 : f32
    %16 = vector.broadcast %cst_11 : f32 to vector<16x128xf32>
    %17 = arith.mulf %15, %16 : vector<16x128xf32>
    %18 = math.exp %17 : vector<16x128xf32>
    %c0_12 = arith.constant 0 : index
    %c0_13 = arith.constant 0 : index
    %19 = vector.load %arg2[%c0_12, %c0_13] : memref<16x128xf32, #tpu.memory_space<vmem>>, vector<16x128xf32>
    %20 = arith.mulf %19, %18 : vector<16x128xf32>
    %21 = arith.addf %20, %14 : vector<16x128xf32>
    %22 = arith.truncf %21 : vector<16x128xf32> to vector<16x128xbf16>
    %c0_14 = arith.constant 0 : index
    %c0_15 = arith.constant 0 : index
    %23 = vector.load %arg7[%c0_14, %c0_15] : memref<128x128xbf16, #tpu.memory_space<vmem>>, vector<128x128xbf16>
    %cst_16 = arith.constant dense<0.000000e+00> : vector<16x128xf32>
    %24 = tpu.matmul %22, %23, %cst_16 {dimension_numbers = #tpu.dot_dimension_numbers<[1], [0], [0], [1], [0, 0, 1, 1], [], []>} : vector<16x128xbf16>, vector<128x128xbf16>, vector<16x128xf32> -> vector<16x128xf32>
    %c0_17 = arith.constant 0 : index
    %c0_18 = arith.constant 0 : index
    %25 = vector.load %arg8[%c0_17, %c0_18] : memref<1x128xf32, #tpu.memory_space<vmem>>, vector<1x128xf32>
    %26 = vector.broadcast %25 : vector<1x128xf32> to vector<16x128xf32>
    %27 = arith.addf %24, %26 : vector<16x128xf32>
    %cst_19 = arith.constant 0.000000e+00 : f32
    %28 = vector.broadcast %cst_19 : f32 to vector<16x128xf32>
    %29 = arith.maximumf %27, %28 : vector<16x128xf32>
    %30 = arith.truncf %29 : vector<16x128xf32> to vector<16x128xbf16>
    %c0_20 = arith.constant 0 : index
    %c0_21 = arith.constant 0 : index
    %31 = vector.load %arg9[%c0_20, %c0_21] : memref<128x1024xbf16, #tpu.memory_space<vmem>>, vector<128x1024xbf16>
    %cst_22 = arith.constant dense<0.000000e+00> : vector<16x1024xf32>
    %32 = tpu.matmul %30, %31, %cst_22 {dimension_numbers = #tpu.dot_dimension_numbers<[1], [0], [0], [1], [0, 0, 1, 1], [], []>} : vector<16x128xbf16>, vector<128x1024xbf16>, vector<16x1024xf32> -> vector<16x1024xf32>
    %c0_23 = arith.constant 0 : index
    %c0_24 = arith.constant 0 : index
    %33 = vector.load %arg10[%c0_23, %c0_24] : memref<1x1024xf32, #tpu.memory_space<vmem>>, vector<1x1024xf32>
    %34 = vector.broadcast %33 : vector<1x1024xf32> to vector<16x1024xf32>
    %35 = arith.addf %32, %34 : vector<16x1024xf32>
    %36 = arith.negf %35 : vector<16x1024xf32>
    %37 = math.exp %36 : vector<16x1024xf32>
    %cst_25 = arith.constant 1.000000e+00 : f32
    %38 = vector.broadcast %cst_25 : f32 to vector<16x1024xf32>
    %39 = arith.addf %38, %37 : vector<16x1024xf32>
    %40 = arith.divf %38, %39 : vector<16x1024xf32>
    %c0_26 = arith.constant 0 : index
    %c0_27 = arith.constant 0 : index
    %41 = vector.load %arg11[%c0_26, %c0_27] : memref<16x1024xf32, #tpu.memory_space<vmem>>, vector<16x1024xf32>
    tpu.vector_store %arg11[%c0_26, %c0_27], %40 {strides = array<i32>} : memref<16x1024xf32, #tpu.memory_space<vmem>>, vector<16x1024xf32>,
    %c0_28 = arith.constant 0 : index
    %c0_29 = arith.constant 0 : index
    %42 = vector.load %arg12[%c0_28, %c0_29] : memref<16x256xf32, #tpu.memory_space<vmem>>, vector<16x256xf32>
    tpu.vector_store %arg12[%c0_28, %c0_29], %13 {strides = array<i32>} : memref<16x256xf32, #tpu.memory_space<vmem>>, vector<16x256xf32>,
    return
  }
  func.func @transform_0(%arg0: i32) -> (i32, i32) {
    %c0_i32 = arith.constant 0 : i32
    %c0_i32_0 = arith.constant 0 : i32
    return %arg0, %c0_i32 : i32, i32
  }
  func.func @transform_1(%arg0: i32) -> (i32, i32) {
    %c0_i32 = arith.constant 0 : i32
    %c0_i32_0 = arith.constant 0 : i32
    return %arg0, %c0_i32 : i32, i32
  }
  func.func @transform_2(%arg0: i32) -> (i32, i32) {
    %c0_i32 = arith.constant 0 : i32
    %c0_i32_0 = arith.constant 0 : i32
    %c0_i32_1 = arith.constant 0 : i32
    return %c0_i32, %c0_i32_0 : i32, i32
  }
  func.func @transform_3(%arg0: i32) -> (i32, i32) {
    %c0_i32 = arith.constant 0 : i32
    %c0_i32_0 = arith.constant 0 : i32
    %c0_i32_1 = arith.constant 0 : i32
    return %c0_i32, %c0_i32_0 : i32, i32
  }
  func.func @transform_4(%arg0: i32) -> (i32, i32) {
    %c0_i32 = arith.constant 0 : i32
    %c0_i32_0 = arith.constant 0 : i32
    %c0_i32_1 = arith.constant 0 : i32
    return %c0_i32, %c0_i32_0 : i32, i32
  }
  func.func @transform_5(%arg0: i32) -> (i32, i32) {
    %c0_i32 = arith.constant 0 : i32
    %c0_i32_0 = arith.constant 0 : i32
    %c0_i32_1 = arith.constant 0 : i32
    return %c0_i32, %c0_i32_0 : i32, i32
  }
  func.func @transform_6(%arg0: i32) -> (i32, i32) {
    %c0_i32 = arith.constant 0 : i32
    %c0_i32_0 = arith.constant 0 : i32
    %c0_i32_1 = arith.constant 0 : i32
    return %c0_i32, %c0_i32_0 : i32, i32
  }
  func.func @transform_7(%arg0: i32) -> (i32, i32) {
    %c0_i32 = arith.constant 0 : i32
    %c0_i32_0 = arith.constant 0 : i32
    %c0_i32_1 = arith.constant 0 : i32
    return %c0_i32, %c0_i32_0 : i32, i32
  }
  func.func @transform_8(%arg0: i32) -> (i32, i32) {
    %c0_i32 = arith.constant 0 : i32
    %c0_i32_0 = arith.constant 0 : i32
    %c0_i32_1 = arith.constant 0 : i32
    return %c0_i32, %c0_i32_0 : i32, i32
  }
  func.func @transform_9(%arg0: i32) -> (i32, i32) {
    %c0_i32 = arith.constant 0 : i32
    %c0_i32_0 = arith.constant 0 : i32
    %c0_i32_1 = arith.constant 0 : i32
    return %c0_i32, %c0_i32_0 : i32, i32
  }
  func.func @transform_10(%arg0: i32) -> (i32, i32) {
    %c0_i32 = arith.constant 0 : i32
    %c0_i32_0 = arith.constant 0 : i32
    return %arg0, %c0_i32 : i32, i32
  }
  func.func @transform_11(%arg0: i32) -> (i32, i32) {
    %c0_i32 = arith.constant 0 : i32
    %c0_i32_0 = arith.constant 0 : i32
    return %arg0, %c0_i32 : i32, i32
  }
}

</mosaic_0001>

<bundles_post_ra>
// kernel: tpu_custom_call.1
= control target key start
LH: loop header
LB: loop body
LE: loop exit
PB: predicated region body
PF: predicated region fallthrough
CT: control target
= control target key end

     0   :  { %17 = vsyncpa [#allocation3], 0  ;;  %s2713_s0 = inlined_call_operand.hbm [shape: bf16[16,1024], index: 0, kind: input, shape index: {}]   ;;  %s2714_s1 = inlined_call_operand.hbm [shape: f32[16,128], index: 1, kind: input, shape index: {}]   ;;  %s2715_s2 = inlined_call_operand.hbm [shape: bf16[1024,128], index: 2, kind: input, shape index: {}]   ;;  %s2716_s3 = inlined_call_operand.vmem [shape: f32[1,128], index: 3, kind: input, shape index: {}]   ;;  %s2717_s4 = inlined_call_operand.hbm [shape: bf16[128,256], index: 4, kind: input, shape index: {}]   ;;  %s2718_s5 = inlined_call_operand.vmem [shape: f32[1,256], index: 5, kind: input, shape index: {}]   ;;  %s2719_s6 = inlined_call_operand.hbm [shape: bf16[128,128], index: 6, kind: input, shape index: {}]   ;;  %s2720_s7 = inlined_call_operand.vmem [shape: f32[1,128], index: 7, kind: input, shape index: {}]   ;;  %s2721_s8 = inlined_call_operand.hbm [shape: bf16[128,1024], index: 8, kind: input, shape index: {}]   ;;  %s2722_s9 = inlined_call_operand.vmem [shape: f32[1,1024], index: 9, kind: input, shape index: {}]   ;;  %s2723_s10 = inlined_call_operand.hbm [shape: f32[16,1024], index: 10, kind: output, shape index: {0}]   ;;  %s2724_s11 = inlined_call_operand.hbm [shape: f32[16,256], index: 11, kind: output, shape index: {1}]  }
   0x1   :  { %18 = vsyncpa [#allocation6], 0 }
   0x2   :  { %19 = vsyncpa [#allocation9], 0 }
   0x3   :  { %20 = vsyncpa [#allocation12], 0 }
   0x4   :  { %21 = vsyncpa [#allocation4], 0 }
   0x5   :  { %22 = vsyncpa [#allocation15], 0  ;;  %s2536_s17 = smov [#allocation5]  }
   0x6   :  { %s40_s18 = sshll.u32 %s2536_s17, 4  ;;  %s41_s18 = int_to_ptr.vmem [resolvable:$true] %s40_s18 }
   0x7   :  { %s2372_s19 = scalar_lea.vmem %s41_s18, 256  ;;  %p2377_p1 = scmp.lt.s32.totalorder %s41_s18, %s41_s18 }
   0x8   :  { %p2373_p0 = scmp.ne.s32.totalorder %s41_s18, %s2372_s19  ;;  %p2378_p2 = scmp.lt.s32.totalorder %s2372_s19, %s2372_s19 }
   0xa   :  { %p2379_p3 = por %p2378_p2, %p2377_p1 }
   0xc   :  { %p2380_p4 = pnand %p2379_p3, %p2373_p0 }
   0xe   :  { %2383 = shalt.err (!%p2380_p4)
}
   0xf   :  { %s2537_s20 = smov 128   ;;  %s2538_s21 = smov 8  }
  0x10   :  { %46 = dma.hbm_to_vmem [thread:$0]  %s2714_s1, 256, %s41_s18, [#allocation6], %s2537_s20, %s2537_s20, %s2538_s21  }
  0x11   :  { %s2539_s24 = smov [#allocation8]   ;;  %s2540_s26 = smov [#allocation2]  }
  0x12   :  { %s66_s25 = sshll.u32 %s2539_s24, 4  ;;  %s28_s27 = sshll.u32 %s2540_s26, 4  ;;  %s67_s25 = int_to_ptr.vmem [resolvable:$true] %s66_s25  ;;  %s29_s27 = int_to_ptr.vmem [resolvable:$true] %s28_s27 }
  0x13   :  { %s2392_s28 = scalar_lea.vmem %s67_s25, 2048  ;;  %p2397_p6 = scmp.lt.s32.totalorder %s67_s25, %s67_s25 }
  0x14   :  { %p2393_p5 = scmp.ne.s32.totalorder %s67_s25, %s2392_s28  ;;  %p2398_p7 = scmp.lt.s32.totalorder %s2392_s28, %s2392_s28 }
  0x16   :  { %p2399_p8 = por %p2398_p7, %p2397_p6 }
  0x18   :  { %p2400_p9 = pnand %p2399_p8, %p2393_p5 }
  0x1a   :  { %2403 = shalt.err (!%p2400_p9)
}
  0x1b   :  { %72 = dma.hbm_to_vmem [thread:$0]  %s2717_s4, 2048, %s67_s25, [#allocation9], %s2537_s20, %s2537_s20, %s2538_s21  }
  0x1c   :  { %s2412_s12 = scalar_lea.vmem %s29_s27, 1024  ;;  %p2417_p11 = scmp.lt.s32.totalorder %s29_s27, %s29_s27 }
  0x1d   :  { %p2413_p10 = scmp.ne.s32.totalorder %s29_s27, %s2412_s12  ;;  %p2418_p12 = scmp.lt.s32.totalorder %s2412_s12, %s2412_s12 }
  0x1f   :  { %p2419_p13 = por %p2418_p12, %p2417_p11 }
  0x21   :  { %p2420_p0 = pnand %p2419_p13, %p2413_p10 }
  0x23   :  { %2423 = shalt.err (!%p2420_p0)
}
  0x24   :  { %s2541_s1 = smov 512   ;;  %s2542_s13 = smov 32  }
  0x25   :  { %34 = dma.hbm_to_vmem [thread:$0]  %s2713_s0, 1024, %s29_s27, [#allocation3], %s2541_s1, %s2541_s1, %s2542_s13  }
  0x26   :  { %s2543_s16 = smov [#allocation7]  }
  0x27   :  { %s52_s17 = sshll.u32 %s2543_s16, 4  ;;  %s53_s17 = int_to_ptr.vmem [resolvable:$true] %s52_s17 }
  0x28   :  { %s2432_s4 = scalar_lea.vmem %s53_s17, 8192  ;;  %p2437_p2 = scmp.lt.s32.totalorder %s53_s17, %s53_s17 }
  0x29   :  { %p2433_p1 = scmp.ne.s32.totalorder %s53_s17, %s2432_s4  ;;  %p2438_p3 = scmp.lt.s32.totalorder %s2432_s4, %s2432_s4 }
  0x2b   :  { %p2439_p4 = por %p2438_p3, %p2437_p2 }
  0x2d   :  { %p2440_p5 = pnand %p2439_p4, %p2433_p1 }
  0x2f   :  { %2443 = shalt.err (!%p2440_p5)
}
  0x30   :  { %s2544_s18 = smov 64   ;;  %s2545_s19 = smov 4  }
  0x31   :  { %58 = dma.hbm_to_vmem [thread:$0]  %s2715_s2, 8192, %s53_s17, [#allocation6], %s2544_s18, %s2544_s18, %s2545_s19  }
  0x32   :  { %s2546_s22 = smov [#allocation10]   ;;  %s2547_s23 = smov [#allocation11]  }
  0x33   :  { %s80_s0 = sshll.u32 %s2546_s22, 4  ;;  %s94_s24 = sshll.u32 %s2547_s23, 4  ;;  %s81_s0 = int_to_ptr.vmem [resolvable:$true] %s80_s0  ;;  %s95_s24 = int_to_ptr.vmem [resolvable:$true] %s94_s24 }
  0x34   :  { %s2452_s25 = scalar_lea.vmem %s81_s0, 1024  ;;  %p2457_p7 = scmp.lt.s32.totalorder %s81_s0, %s81_s0 }
  0x35   :  { %p2453_p6 = scmp.ne.s32.totalorder %s81_s0, %s2452_s25  ;;  %p2458_p8 = scmp.lt.s32.totalorder %s2452_s25, %s2452_s25 }
  0x37   :  { %p2459_p9 = por %p2458_p8, %p2457_p7 }
  0x39   :  { %p2460_p10 = pnand %p2459_p9, %p2453_p6 }
  0x3b   :  { %2463 = shalt.err (!%p2460_p10)
}
  0x3c   :  { %86 = dma.hbm_to_vmem [thread:$0]  %s2719_s6, 1024, %s81_s0, [#allocation9], %s2544_s18, %s2544_s18, %s2545_s19  }
  0x3d   :  { %s2472_s2 = scalar_lea.vmem %s95_s24, 8192  ;;  %p2477_p12 = scmp.lt.s32.totalorder %s95_s24, %s95_s24 }
  0x3e   :  { %p2473_p11 = scmp.ne.s32.totalorder %s95_s24, %s2472_s2  ;;  %p2478_p13 = scmp.lt.s32.totalorder %s2472_s2, %s2472_s2 }
  0x40   :  { %p2479_p0 = por %p2478_p13, %p2477_p12 }
  0x42   :  { %p2480_p1 = pnand %p2479_p0, %p2473_p11 }
  0x44   :  { %2483 = shalt.err (!%p2480_p1)
}
  0x45   :  { %100 = dma.hbm_to_vmem [thread:$0]  %s2721_s8, 8192, %s95_s24, [#allocation12], %s2541_s1, %s2541_s1, %s2542_s13  }
  0x46   :  { %2524 = dma.done.wait [#allocation3], 1024  }
  0x47   :  { %2525 = vsyncadd [#allocation3], 4294966272 }
  0x48   :  { %2526 = dma.done.wait [#allocation6], 8448  }
  0x49   :  { %2527 = vsyncadd [#allocation6], 4294958848 }
  0x4a   :  { %2528 = dma.done.wait [#allocation9], 3072  }
  0x4b   :  { %2529 = vsyncadd [#allocation9], 4294964224 }
  0x4c   :  { %2530 = dma.done.wait [#allocation12], 8192  }
  0x4d   :  { %2531 = vsyncadd [#allocation12], 4294959104  ;;  %v2200_v0 = vld [vmem:[#allocation7 + $0x78] sm:$0xff]   ;;  %v2204_v4 = vld [vmem:[#allocation7 + $0x70] sm:$0xff]   ;;  %vm2550_vm0 = vmmov 0  }
  0x4e   :  { %v2201_v1 = vld [vmem:[#allocation7 + $0xf8] sm:$0xff]   ;;  %2063 = vmatprep.subr.bf16.mxu0 %v2200_v0  ;;  %v2205_v5 = vld [vmem:[#allocation7 + $0xf0] sm:$0xff]   ;;  %v2208_v8 = vld [vmem:[#allocation7 + $0x68] sm:$0xff]  }
  0x4f   :  { %v2202_v2 = vld [vmem:[#allocation7 + $0x38] sm:$0xff]   ;;  %2085 = vmatprep.subr.bf16.mxu1 %v2201_v1  ;;  %v2206_v6 = vld [vmem:[#allocation7 + $0x30] sm:$0xff]   ;;  %v2209_v9 = vld [vmem:[#allocation7 + $0xe8] sm:$0xff]  }
  0x50   :  { %v2203_v3 = vld [vmem:[#allocation7 + $0xb8] sm:$0xff]   ;;  %2064 = vmatpush3.bf16.msra.mxu0 %v2202_v2  ;;  %v2207_v7 = vld [vmem:[#allocation7 + $0xb0] sm:$0xff]   ;;  %v2210_v10 = vld [vmem:[#allocation7 + $0x28] sm:$0xff]  }
  0x51   :  { %2086 = vmatpush3.bf16.msra.mxu1 %v2203_v3  ;;  %2065 = vmatprep.subr.bf16.mxu0 %v2204_v4  ;;  %v2211_v11 = vld [vmem:[#allocation7 + $0xa8] sm:$0xff]   ;;  %v2212_v12 = vld [vmem:[#allocation7 + $0x60] sm:$0xff]   ;;  %v2216_v16 = vld [vmem:[#allocation7 + $0x58] sm:$0xff]  }
  0x52   :  { %2087 = vmatprep.subr.bf16.mxu1 %v2205_v5  ;;  %v2213_v13 = vld [vmem:[#allocation7 + $0xe0] sm:$0xff]   ;;  %v2217_v17 = vld [vmem:[#allocation7 + $0xd8] sm:$0xff]   ;;  %v2220_v20 = vld [vmem:[#allocation7 + $0x50] sm:$0xff]  }
  0x53   :  { %v2214_v14 = vld [vmem:[#allocation7 + $0x20] sm:$0xff]   ;;  %v2218_v18 = vld [vmem:[#allocation7 + $0x18] sm:$0xff]   ;;  %v2221_v21 = vld [vmem:[#allocation7 + $0xd0] sm:$0xff]  }
  0x54   :  { %2066 = vmatpush3.bf16.msra.mxu0 %v2206_v6  ;;  %v2215_v15 = vld [vmem:[#allocation7 + $0xa0] sm:$0xff]   ;;  %v2219_v19 = vld [vmem:[#allocation7 + $0x98] sm:$0xff]   ;;  %v2222_v22 = vld [vmem:[#allocation7 + $0x10] sm:$0xff]  }
  0x55   :  { %2088 = vmatpush3.bf16.msra.mxu1 %v2207_v7  ;;  %2067 = vmatprep.subr.bf16.mxu0 %v2208_v8  ;;  %v2223_v23 = vld [vmem:[#allocation7 + $0x90] sm:$0xff]   ;;  %v2224_v24 = vld [vmem:[#allocation7 + $0x48] sm:$0xff]   ;;  %v2228_v28 = vld [vmem:[#allocation7 + $0x40] sm:$0xff]  }
  0x56   :  { %2089 = vmatprep.subr.bf16.mxu1 %v2209_v9  ;;  %v2225_v25 = vld [vmem:[#allocation7 + $0xc8] sm:$0xff]   ;;  %v2229_v29 = vld [vmem:[#allocation7 + $0xc0] sm:$0xff]   ;;  %v122_v32 = vld [vmem:[#allocation2] sm:$0xff] }
  0x57   :  { %v2226_v26 = vld [vmem:[#allocation7 + $0x8] sm:$0xff]   ;;  %v2230_v30 = vld [vmem:[#allocation7] sm:$0xff]   ;;  %v126_v33 = vld [vmem:[#allocation2 + $0x20] sm:$0xff] }
  0x58   :  { %2068 = vmatpush3.bf16.msra.mxu0 %v2210_v10  ;;  %v2227_v27 = vld [vmem:[#allocation7 + $0x88] sm:$0xff]   ;;  %v2231_v31 = vld [vmem:[#allocation7 + $0x80] sm:$0xff]   ;;  %v123_v34 = vld [vmem:[#allocation2 + $0x8] sm:$0xff]  ;;  %v1886_v35 = vcombine.low %v122_v32, %v126_v33  ;;  %v1887_v36 = vcombine.high %v122_v32, %v126_v33  ;;  %v2548_v32 = vmov 0  }
  0x59   :  { %2090 = vmatpush3.bf16.msra.mxu1 %v2211_v11  ;;  %2069 = vmatprep.subr.bf16.mxu0 %v2212_v12  ;;  %v127_v37 = vld [vmem:[#allocation2 + $0x28] sm:$0xff]  ;;  %v2236_v44 = vld [vmem:[#allocation7 + $0x170] sm:$0xff]   ;;  %v2240_v48 = vld [vmem:[#allocation7 + $0x168] sm:$0xff]  }
  0x5a   :  { %2091 = vmatprep.subr.bf16.mxu1 %v2213_v13  ;;  %v1888_v38 = vcombine.low %v123_v34, %v127_v37  ;;  %v1889_v39 = vcombine.high %v123_v34, %v127_v37  ;;  %v2232_v40 = vld [vmem:[#allocation7 + $0x178] sm:$0xff]   ;;  %721 = vmatprep.mubr.bf16.mxu0 %v1887_v36  ;;  %v2237_v45 = vld [vmem:[#allocation7 + $0x1f0] sm:$0xff]   ;;  %v2241_v49 = vld [vmem:[#allocation7 + $0x1e8] sm:$0xff]  }
  0x5b   :  { %v2233_v41 = vld [vmem:[#allocation7 + $0x1f8] sm:$0xff]   ;;  %v2238_v46 = vld [vmem:[#allocation7 + $0x130] sm:$0xff]   ;;  %v2242_v50 = vld [vmem:[#allocation7 + $0x128] sm:$0xff]  }
  0x5c   :  { %2070 = vmatpush3.bf16.msra.mxu0 %v2214_v14  ;;  %762 = vmatprep.mubr.bf16.mxu1 %v1889_v39  ;;  %v2234_v42 = vld [vmem:[#allocation7 + $0x138] sm:$0xff]   ;;  %v2239_v47 = vld [vmem:[#allocation7 + $0x1b0] sm:$0xff]   ;;  %v2243_v51 = vld [vmem:[#allocation7 + $0x1a8] sm:$0xff]  }
  0x5d   :  { %2092 = vmatpush3.bf16.msra.mxu1 %v2215_v15  ;;  %2071 = vmatprep.subr.bf16.mxu0 %v2216_v16  ;;  %v2235_v43 = vld [vmem:[#allocation7 + $0x1b8] sm:$0xff]   ;;  %v2244_v52 = vld [vmem:[#allocation7 + $0x160] sm:$0xff]   ;;  %v2252_v60 = vld [vmem:[#allocation7 + $0x150] sm:$0xff]  }
  0x5e   :  { %2093 = vmatprep.subr.bf16.mxu1 %v2217_v17  ;;  %v2245_v53 = vld [vmem:[#allocation7 + $0x1e0] sm:$0xff]   ;;  %v2248_v56 = vld [vmem:[#allocation7 + $0x158] sm:$0xff]   ;;  %v2253_v61 = vld [vmem:[#allocation7 + $0x1d0] sm:$0xff]  }
  0x5f   :  { %v2246_v54 = vld [vmem:[#allocation7 + $0x120] sm:$0xff]   ;;  %v2249_v57 = vld [vmem:[#allocation7 + $0x1d8] sm:$0xff]   ;;  %v2254_v62 = vld [vmem:[#allocation7 + $0x110] sm:$0xff]  }
  0x60   :  { %2072 = vmatpush3.bf16.msra.mxu0 %v2218_v18  ;;  %v2247_v55 = vld [vmem:[#allocation7 + $0x1a0] sm:$0xff]   ;;  %v2250_v58 = vld [vmem:[#allocation7 + $0x118] sm:$0xff]   ;;  %v2255_v63 = vld [vmem:[#allocation7 + $0x190] sm:$0xff]  }
  0x61   :  { %2094 = vmatpush3.bf16.msra.mxu1 %v2219_v19  ;;  %2073 = vmatprep.subr.bf16.mxu0 %v2220_v20  ;;  %v2251_v59 = vld [vmem:[#allocation7 + $0x198] sm:$0xff]   ;;  %v2256_v0 = vld [vmem:[#allocation7 + $0x148] sm:$0xff]   ;;  %v2260_v4 = vld [vmem:[#allocation7 + $0x140] sm:$0xff]  }
  0x62   :  { %2095 = vmatprep.subr.bf16.mxu1 %v2221_v21  ;;  %v2257_v1 = vld [vmem:[#allocation7 + $0x1c8] sm:$0xff]   ;;  %v2261_v5 = vld [vmem:[#allocation7 + $0x1c0] sm:$0xff]   ;;  %v2264_v16 = vld [vmem:[#allocation8 + $0x70] ss:$8 sps:$4 sm:$0xff]  }
  0x63   :  { %v2258_v2 = vld [vmem:[#allocation7 + $0x108] sm:$0xff]   ;;  %v2262_v6 = vld [vmem:[#allocation7 + $0x100] sm:$0xff]   ;;  %v2266_v17 = vld [vmem:[#allocation8 + $0x74] ss:$8 sps:$4 sm:$0xff]  }
  0x64   :  { %2074 = vmatpush3.bf16.msra.mxu0 %v2222_v22  ;;  %v2259_v3 = vld [vmem:[#allocation7 + $0x188] sm:$0xff]   ;;  %v2263_v7 = vld [vmem:[#allocation7 + $0x180] sm:$0xff]   ;;  %v2272_v20 = vld [vmem:[#allocation8 + $0x54] ss:$8 sps:$4 sm:$0xff]  }
  0x65   :  { %2096 = vmatpush3.bf16.msra.mxu1 %v2223_v23  ;;  %2075 = vmatprep.subr.bf16.mxu0 %v2224_v24  ;;  %v124_v8 = vld [vmem:[#allocation2 + $0x10] sm:$0xff]  ;;  %v125_v12 = vld [vmem:[#allocation2 + $0x18] sm:$0xff]  ;;  %v2270_v21 = vld [vmem:[#allocation8 + $0x50] ss:$8 sps:$4 sm:$0xff]  }
  0x66   :  { %2097 = vmatprep.subr.bf16.mxu1 %v2225_v25  ;;  %v128_v9 = vld [vmem:[#allocation2 + $0x30] sm:$0xff]  ;;  %v129_v13 = vld [vmem:[#allocation2 + $0x38] sm:$0xff]  ;;  %v2278_v24 = vld [vmem:[#allocation8 + $0x34] ss:$8 sps:$4 sm:$0xff]  }
  0x67   :  { %v1890_v10 = vcombine.low %v124_v8, %v128_v9  ;;  %v1891_v11 = vcombine.high %v124_v8, %v128_v9  ;;  %v1892_v14 = vcombine.low %v125_v12, %v129_v13  ;;  %v1893_v15 = vcombine.high %v125_v12, %v129_v13  ;;  %v2269_v18 = vld [vmem:[#allocation8 + $0x64] ss:$8 sps:$4 sm:$0xff]   ;;  %v2267_v19 = vld [vmem:[#allocation8 + $0x60] ss:$8 sps:$4 sm:$0xff]   ;;  %v2276_v25 = vld [vmem:[#allocation8 + $0x30] ss:$8 sps:$4 sm:$0xff]  }
  0x68   :  { %2076 = vmatpush3.bf16.msra.mxu0 %v2226_v26  ;;  %v2275_v22 = vld [vmem:[#allocation8 + $0x44] ss:$8 sps:$4 sm:$0xff]   ;;  %v2273_v23 = vld [vmem:[#allocation8 + $0x40] ss:$8 sps:$4 sm:$0xff]  }
  0x69   :  { %2098 = vmatpush3.bf16.msra.mxu1 %v2227_v27  ;;  %2077 = vmatprep.subr.bf16.mxu0 %v2228_v28  ;;  %v2281_v26 = vld [vmem:[#allocation8 + $0x24] ss:$8 sps:$4 sm:$0xff]   ;;  %v2279_v27 = vld [vmem:[#allocation8 + $0x20] ss:$8 sps:$4 sm:$0xff]   ;;  %v2284_v28 = vld [vmem:[#allocation8 + $0x14] ss:$8 sps:$4 sm:$0xff]  }
  0x6a   :  { %2099 = vmatprep.subr.bf16.mxu1 %v2229_v29  ;;  %v2282_v29 = vld [vmem:[#allocation8 + $0x10] ss:$8 sps:$4 sm:$0xff]   ;;  %v2290_v8 = vld [vmem:[#allocation10 + $0x28] sm:$0xff]   ;;  %v2291_v9 = vld [vmem:[#allocation10 + $0x20] sm:$0xff]  }
  0x6b   :  { %v2294_v12 = vld [vmem:[#allocation10 + $0x8] sm:$0xff]   ;;  %v2295_v13 = vld [vmem:[#allocation10] sm:$0xff]  }
  0x6c   :  { %2078 = vmatpush3.bf16.msra.mxu0 %v2230_v30  ;;  %v2287_v30 = vld [vmem:[#allocation8 + $0x4] ss:$8 sps:$4 sm:$0xff]  }
  0x6d   :  { %2100 = vmatpush3.bf16.msra.mxu1 %v2231_v31  ;;  %2107 = vmatprep.subr.bf16.mxu0 %v2232_v40  ;;  %v2285_v31 = vld [vmem:[#allocation8] ss:$8 sps:$4 sm:$0xff]   ;;  %v1885_v40 = vld [vmem:[%s2716_s3] ss:$0 sm:$0xff] }
  0x6e   :  { %2129 = vmatprep.subr.bf16.mxu1 %v2233_v41 }
  0x6f   :  { %722 = vmatmul.mubr.bf16.vlgmr.msra.gmra.mxu0 %v1886_v35 }
  0x70   :  { %763 = vmatmul.mubr.bf16.vlgmr.msra.gmra.mxu1 %v1888_v38  ;;  %2108 = vmatpush3.bf16.msra.mxu0 %v2234_v42 }
  0x71   :  { %2130 = vmatpush3.bf16.msra.mxu1 %v2235_v43  ;;  %2109 = vmatprep.subr.bf16.mxu0 %v2236_v44 }
  0x72   :  { %2131 = vmatprep.subr.bf16.mxu1 %v2237_v45  ;;  %803 = vmatprep.mubr.bf16.mxu0 %v1891_v11  ;;  %v2293_v11 = vld [vmem:[#allocation10 + $0x10] sm:$0xff]  }
  0x73   :  { %844 = vmatprep.mubr.bf16.mxu1 %v1893_v15  ;;  %v1195_v15 = vld [vmem:[#allocation11 + $0x1e0] sm:$0xff] }
  0x74   :  { %2110 = vmatpush3.bf16.msra.mxu0 %v2238_v46 }
  0x75   :  { %2132 = vmatpush3.bf16.msra.mxu1 %v2239_v47  ;;  %2111 = vmatprep.subr.bf16.mxu0 %v2240_v48 }
  0x76   :  { %2133 = vmatprep.subr.bf16.mxu1 %v2241_v49 }
  0x78   :  { %2112 = vmatpush3.bf16.msra.mxu0 %v2242_v50 }
  0x79   :  { %2134 = vmatpush3.bf16.msra.mxu1 %v2243_v51  ;;  %2113 = vmatprep.subr.bf16.mxu0 %v2244_v52 }
  0x7a   :  { %2135 = vmatprep.subr.bf16.mxu1 %v2245_v53 }
  0x7c   :  { %2114 = vmatpush3.bf16.msra.mxu0 %v2246_v54 }
  0x7d   :  { %2136 = vmatpush3.bf16.msra.mxu1 %v2247_v55  ;;  %2115 = vmatprep.subr.bf16.mxu0 %v2248_v56 }
  0x7e   :  { %2137 = vmatprep.subr.bf16.mxu1 %v2249_v57 }
  0x80   :  { %2116 = vmatpush3.bf16.msra.mxu0 %v2250_v58 }
  0x81   :  { %2138 = vmatpush3.bf16.msra.mxu1 %v2251_v59  ;;  %2117 = vmatprep.subr.bf16.mxu0 %v2252_v60 }
  0x82   :  { %2139 = vmatprep.subr.bf16.mxu1 %v2253_v61 }
  0x84   :  { %2118 = vmatpush3.bf16.msra.mxu0 %v2254_v62 }
  0x85   :  { %2140 = vmatpush3.bf16.msra.mxu1 %v2255_v63  ;;  %2119 = vmatprep.subr.bf16.mxu0 %v2256_v0 }
  0x86   :  { %2141 = vmatprep.subr.bf16.mxu1 %v2257_v1 }
  0x88   :  { %2120 = vmatpush3.bf16.msra.mxu0 %v2258_v2 }
  0x89   :  { %2142 = vmatpush3.bf16.msra.mxu1 %v2259_v3  ;;  %2121 = vmatprep.subr.bf16.mxu0 %v2260_v4 }
  0x8a   :  { %2143 = vmatprep.subr.bf16.mxu1 %v2261_v5  ;;  %v2288_v5 = vld [vmem:[#allocation10 + $0x38] sm:$0xff]  }
  0x8c   :  { %2122 = vmatpush3.bf16.msra.mxu0 %v2262_v6  ;;  %v2549_v6 = vmov 0.0  }
  0x8d   :  { %2144 = vmatpush3.bf16.msra.mxu1 %v2263_v7  ;;  %964 = vmatprep.subr.bf16.mxu0 %v2266_v17  ;;  %v2289_v7 = vld [vmem:[#allocation10 + $0x30] sm:$0xff]  }
  0x8e   :  { %2160 = vmatprep.subr.bf16.mxu1 %v2549_v6 }
  0x8f   :  { %804 = vmatmul.mubr.bf16.vlgmr.msra.gmra.mxu0 %v1890_v10  ;;  %v2292_v10 = vld [vmem:[#allocation10 + $0x18] sm:$0xff]  }
  0x90   :  { %845 = vmatmul.mubr.bf16.vlgmr.msra.gmra.mxu1 %v1892_v14  ;;  %965 = vmatpush1.bf16.msra.mxu0 %v2264_v16  ;;  %v1191_v14 = vld [vmem:[#allocation11 + $0x1c0] sm:$0xff]  ;;  %v2649_v16 = vld [vmem:[#allocation11 + $0x1c8] sm:$0xff] }
  0x91   :  { %966 = vmatprep.subr.bf16.mxu0 %v2269_v18  ;;  %996 = vmatprep.mubr.bf16.mxu0 %v2548_v32  ;;  %v2039_v17 = vcombine.low %v1191_v14, %v1195_v15  ;;  %v2040_v18 = vcombine.high %v1191_v14, %v1195_v15  ;;  %v1168_v14 = vld [vmem:[#allocation11 + $0x108] sm:$0xff] }
  0x92   :  { %2161 = vmatpush3.bf16.msra.mxu1 %v2288_v5  ;;  %2176 = vmatprep.mubr.msk.bf16.mxu1 %vm2550_vm0, %v2549_v6  ;;  %v1188_v5 = vld [vmem:[#allocation11 + $0x1a8] sm:$0xff] }
  0x93   :  { %2162 = vmatprep.subr.bf16.mxu1 %v2549_v6  ;;  %v1172_v15 = vld [vmem:[#allocation11 + $0x128] sm:$0xff] }
  0x94   :  { %967 = vmatpush1.bf16.msra.mxu0 %v2267_v19  ;;  %v2651_v19 = vld [vmem:[#allocation11 + $0x1e8] sm:$0xff] }
  0x95   :  { %968 = vmatprep.subr.bf16.mxu0 %v2272_v20  ;;  %v1183_v20 = vld [vmem:[#allocation11 + $0x180] sm:$0xff] }
  0x96   :  { %2163 = vmatpush3.bf16.msra.mxu1 %v2289_v7 }
  0x97   :  { %2164 = vmatprep.subr.bf16.mxu1 %v2549_v6 }
  0x98   :  { %969 = vmatpush1.bf16.msra.mxu0 %v2270_v21  ;;  %v1187_v21 = vld [vmem:[#allocation11 + $0x1a0] sm:$0xff] }
  0x99   :  { %970 = vmatprep.subr.bf16.mxu0 %v2275_v22  ;;  %v2041_v22 = vcombine.low %v2649_v16, %v2651_v19 }
  0x9a   :  { %2165 = vmatpush3.bf16.msra.mxu1 %v2290_v8 }
  0x9b   :  { %2166 = vmatprep.subr.bf16.mxu1 %v2549_v6 }
  0x9c   :  { %971 = vmatpush1.bf16.msra.mxu0 %v2273_v23  ;;  %v2042_v23 = vcombine.high %v2649_v16, %v2651_v19  ;;  %v1156_v16 = vld [vmem:[#allocation11 + $0xa8] sm:$0xff] }
  0x9d   :  { %972 = vmatprep.subr.bf16.mxu0 %v2278_v24  ;;  %v2032_v24 = vcombine.high %v1183_v20, %v1187_v21 }
  0x9e   :  { %2167 = vmatpush3.bf16.msra.mxu1 %v2291_v9 }
  0x9f   :  { %2168 = vmatprep.subr.bf16.mxu1 %v2549_v6 }
  0xa0   :  { %973 = vmatpush1.bf16.msra.mxu0 %v2276_v25  ;;  %v2031_v25 = vcombine.low %v1183_v20, %v1187_v21  ;;  %v1160_v20 = vld [vmem:[#allocation11 + $0xc8] sm:$0xff] }
  0xa1   :  { %974 = vmatprep.subr.bf16.mxu0 %v2281_v26  ;;  %v1175_v26 = vld [vmem:[#allocation11 + $0x140] sm:$0xff]  ;;  %v1164_v21 = vld [vmem:[#allocation11 + $0xe8] sm:$0xff] }
  0xa2   :  { %2169 = vmatpush3.bf16.msra.mxu1 %v2292_v10  ;;  %v1176_v10 = vld [vmem:[#allocation11 + $0x148] sm:$0xff]  ;;  %v2009_v19 = vcombine.low %v1160_v20, %v1164_v21 }
  0xa3   :  { %2170 = vmatprep.subr.bf16.mxu1 %v2549_v6 }
  0xa4   :  { %975 = vmatpush1.bf16.msra.mxu0 %v2279_v27  ;;  %v1179_v27 = vld [vmem:[#allocation11 + $0x160] sm:$0xff] }
  0xa5   :  { %976 = vmatprep.subr.bf16.mxu0 %v2284_v28  ;;  %v2024_v28 = vcombine.high %v1175_v26, %v1179_v27 }
  0xa6   :  { %2171 = vmatpush3.bf16.msra.mxu1 %v2293_v11  ;;  %v1180_v11 = vld [vmem:[#allocation11 + $0x168] sm:$0xff] }
  0xa7   :  { %2172 = vmatprep.subr.bf16.mxu1 %v2549_v6 }
  0xa8   :  { %977 = vmatpush1.bf16.msra.mxu0 %v2282_v29  ;;  %v2023_v29 = vcombine.low %v1175_v26, %v1179_v27  ;;  %v1143_v27 = vld [vmem:[#allocation11 + $0x40] sm:$0xff] }
  0xa9   :  { %978 = vmatprep.subr.bf16.mxu0 %v2287_v30  ;;  %v1167_v30 = vld [vmem:[#allocation11 + $0x100] sm:$0xff] }
  0xaa   :  { %2173 = vmatpush3.bf16.msra.mxu1 %v2294_v12 }
  0xab   :  { %2174 = vmatprep.subr.bf16.mxu1 %v2549_v6 }
  0xac   :  { %979 = vmatpush1.bf16.msra.mxu0 %v2285_v31  ;;  %v1171_v31 = vld [vmem:[#allocation11 + $0x120] sm:$0xff] }
  0xad   :  { %1561 = vmatprep.subr.bf16.mxu0 %v2040_v18  ;;  %v2018_v18 = vcombine.high %v1168_v14, %v1172_v15 }
  0xae   :  { %2175 = vmatpush3.bf16.msra.mxu1 %v2295_v13  ;;  %v2026_v13 = vcombine.high %v1176_v10, %v1180_v11 }
  0xaf   :  { %1604 = vmatprep.subr.bf16.mxu1 %v2042_v23  ;;  %v2017_v23 = vcombine.low %v1168_v14, %v1172_v15  ;;  %v1169_v15 = vld [vmem:[#allocation11 + $0x110] sm:$0xff] }
 0x12f   :  { %v2079_v33 = vpop.f32.mrf.mxu0 }
 0x130   :  { %v2101_v34 = vpop.f32.mrf.mxu1 }
 0x131   :  { %v2080_v35 = vpop.f32.mrf.mxu0 }
 0x132   :  { %v2102_v36 = vpop.f32.mrf.mxu1  ;;  %v2081_v38 = vadd.f32 %v2080_v35, %v2079_v33  ;;  %v2016_v33 = vcombine.high %v1167_v30, %v1171_v31  ;;  %v1159_v35 = vld [vmem:[#allocation11 + $0xc0] sm:$0xff] }
 0x133   :  { %v2082_v37 = vpop.f32.mrf.mxu0  ;;  %v2103_v43 = vadd.f32 %v2102_v36, %v2101_v34  ;;  %v2015_v34 = vcombine.low %v1167_v30, %v1171_v31  ;;  %v1163_v36 = vld [vmem:[#allocation11 + $0xe0] sm:$0xff]  ;;  %v1148_v31 = vld [vmem:[#allocation11 + $0x68] sm:$0xff] }
 0x134   :  { %v2104_v39 = vpop.f32.mrf.mxu1  ;;  %v724_v42 = vadd.f32 %v2081_v38, %v1885_v40  ;;  %v2007_v38 = vcombine.low %v1159_v35, %v1163_v36 }
 0x135   :  { %v2083_v41 = vpop.f32.mrf.mxu0 }
 0x136   :  { %v2084_v44 = vadd.f32 %v2083_v41, %v2082_v37  ;;  %v2105_v45 = vpop.f32.mrf.mxu1  ;;  %v765_v49 = vadd.f32 %v2103_v43, %v724_v42  ;;  %v2008_v37 = vcombine.high %v1159_v35, %v1163_v36  ;;  %v874_v43 = vlaneseq  ;;  %v1135_v36 = vld [vmem:[#allocation11] sm:$0xff] }
 0x137   :  { %v2106_v54 = vadd.f32 %v2105_v45, %v2104_v39  ;;  %v1151_v39 = vld [vmem:[#allocation11 + $0x80] sm:$0xff] }
 0x138   :  { %v727_v50 = vadd.f32 %v2084_v44, %v1885_v40  ;;  %v1155_v40 = vld [vmem:[#allocation11 + $0xa0] sm:$0xff]  ;;  %v2657_v44 = vshrl.u32 %v874_v43, 7 }
 0x139   :  { %v2000_v41 = vcombine.high %v1151_v39, %v1155_v40  ;;  %v1999_v42 = vcombine.low %v1151_v39, %v1155_v40  ;;  %v1140_v40 = vld [vmem:[#allocation11 + $0x28] sm:$0xff] }
 0x13a   :  { %v768_v58 = vadd.f32 %v2106_v54, %v727_v50  ;;  %v876_v45 = vsub.s32 0, %v2657_v44 }
 0x14f   :  { %v2123_v46 = vpop.f32.mrf.mxu0 }
 0x150   :  { %v2145_v47 = vpop.f32.mrf.mxu1 }
 0x151   :  { %v2124_v48 = vpop.f32.mrf.mxu0 }
 0x152   :  { %v2125_v51 = vadd.f32 %v2124_v48, %v2123_v46  ;;  %v2146_v52 = vpop.f32.mrf.mxu1  ;;  %v872_v46 = vld [vmem:[%s2718_s5] sm:$0x3] }
 0x153   :  { %v2126_v53 = vpop.f32.mrf.mxu0  ;;  %v2147_v59 = vadd.f32 %v2146_v52, %v2145_v47  ;;  %v880_v47 = vsub.s32 1, %v2657_v44  ;;  %v877_v48 = vrot.slane %v872_v46, %v876_v45 }
 0x154   :  { %v806_v55 = vadd.f32 %v2125_v51, %v765_v49  ;;  %v2148_v56 = vpop.f32.mrf.mxu1 }
 0x155   :  { %v2127_v57 = vpop.f32.mrf.mxu0  ;;  %v881_v49 = vrot.slane %v872_v46, %v880_v47  ;;  %v1193_v46 = vld [vmem:[#allocation11 + $0x1d0] sm:$0xff] }
 0x156   :  { %v2128_v60 = vadd.f32 %v2127_v57, %v2126_v53  ;;  %v2149_v61 = vpop.f32.mrf.mxu1  ;;  %v847_v62 = vadd.f32 %v2147_v59, %v806_v55 }
 0x157   :  { %v2150_v0 = vadd.f32 %v2149_v61, %v2148_v56 }
 0x158   :  { %v809_v63 = vadd.f32 %v2128_v60, %v768_v58  ;;  %v853_v2 = vmax.f32 %v847_v62, 0.0 }
 0x15a   :  { %v850_v1 = vadd.f32 %v2150_v0, %v809_v63  ;;  %v1013_v63 = vld [vmem:[#allocation5] sm:$0xff]  ;;  %v1014_v0 = vld [vmem:[#allocation5 + $0x8] sm:$0xff] }
 0x15c   :  { %v854_v3 = vmax.f32 %v850_v1, 0.0 }
 0x15e   :  { %v855_v4 = vpack.c.bf16 %v854_v3, %v853_v2 }
 0x160   :  { %997 = vmatmul.mubr.bf16.vlgmr.msra.gmra.mxu0 %v855_v4  ;;  %v1184_v4 = vld [vmem:[#allocation11 + $0x188] sm:$0xff] }
 0x161   :  { %1593 = vmatprep.mubr.bf16.mxu0 %v2548_v32  ;;  %1562 = vmatpush1.bf16.msra.mxu0 %v2039_v17  ;;  %v2034_v9 = vcombine.high %v1184_v4, %v1188_v5  ;;  %v2033_v12 = vcombine.low %v1184_v4, %v1188_v5  ;;  %v2025_v17 = vcombine.low %v1176_v10, %v1180_v11  ;;  %v1182_v10 = vld [vmem:[#allocation11 + $0x178] sm:$0xff] }
 0x162   :  { %1563 = vmatprep.subr.bf16.mxu0 %v2032_v24  ;;  %v2010_v24 = vcombine.high %v1160_v20, %v1164_v21  ;;  %v1174_v20 = vld [vmem:[#allocation11 + $0x138] sm:$0xff] }
 0x165   :  { %1564 = vmatpush1.bf16.msra.mxu0 %v2031_v25  ;;  %v1152_v25 = vld [vmem:[#allocation11 + $0x88] sm:$0xff] }
 0x166   :  { %1565 = vmatprep.subr.bf16.mxu0 %v2024_v28  ;;  %v2001_v26 = vcombine.low %v1152_v25, %v1156_v16  ;;  %v1147_v28 = vld [vmem:[#allocation11 + $0x60] sm:$0xff] }
 0x167   :  { %v1992_v30 = vcombine.high %v1143_v27, %v1147_v28 }
 0x169   :  { %1566 = vmatpush1.bf16.msra.mxu0 %v2023_v29  ;;  %v1144_v29 = vld [vmem:[#allocation11 + $0x48] sm:$0xff] }
 0x16a   :  { %1567 = vmatprep.subr.bf16.mxu0 %v2016_v33  ;;  %v1991_v33 = vcombine.low %v1143_v27, %v1147_v28  ;;  %v1994_v35 = vcombine.high %v1144_v29, %v1148_v31 }
 0x16d   :  { %1568 = vmatpush1.bf16.msra.mxu0 %v2015_v34  ;;  %v1993_v34 = vcombine.low %v1144_v29, %v1148_v31  ;;  %v1157_v31 = vld [vmem:[#allocation11 + $0xb0] sm:$0xff] }
 0x16e   :  { %1569 = vmatprep.subr.bf16.mxu0 %v2008_v37  ;;  %v1139_v37 = vld [vmem:[#allocation11 + $0x20] sm:$0xff] }
 0x16f   :  { %v1984_v39 = vcombine.high %v1135_v36, %v1139_v37 }
 0x171   :  { %1570 = vmatpush1.bf16.msra.mxu0 %v2007_v38  ;;  %v1136_v38 = vld [vmem:[#allocation11 + $0x8] sm:$0xff] }
 0x172   :  { %1571 = vmatprep.subr.bf16.mxu0 %v2000_v41  ;;  %v1983_v41 = vcombine.low %v1135_v36, %v1139_v37  ;;  %v1986_v43 = vcombine.high %v1136_v38, %v1140_v40 }
 0x175   :  { %1572 = vmatpush1.bf16.msra.mxu0 %v1999_v42  ;;  %v1985_v42 = vcombine.low %v1136_v38, %v1140_v40  ;;  %v1149_v40 = vld [vmem:[#allocation11 + $0x70] sm:$0xff] }
 0x176   :  { %1573 = vmatprep.subr.bf16.mxu0 %v1992_v30  ;;  %v1153_v30 = vld [vmem:[#allocation11 + $0x90] sm:$0xff] }
 0x177   :  { %v2004_v37 = vcombine.high %v1153_v30, %v1157_v31 }
 0x179   :  { %1574 = vmatpush1.bf16.msra.mxu0 %v1991_v33  ;;  %v1154_v33 = vld [vmem:[#allocation11 + $0x98] sm:$0xff] }
 0x17a   :  { %1575 = vmatprep.subr.bf16.mxu0 %v1984_v39  ;;  %v1145_v39 = vld [vmem:[#allocation11 + $0x50] sm:$0xff] }
 0x17d   :  { %1576 = vmatpush1.bf16.msra.mxu0 %v1983_v41  ;;  %v1146_v41 = vld [vmem:[#allocation11 + $0x58] sm:$0xff] }
 0x220   :  { %v998_v50 = vpop.f32.mrf.mxu0 }
 0x221   :  { %v999_v51 = vadd.f32 %v998_v50, %v877_v48 }
 0x222   :  { %v1000_v52 = vpop.f32.mrf.mxu0 }
 0x223   :  { %1845 = vst [vmem:[#allocation14] sm:$0xff] %v999_v51  ;;  %v1001_v53 = vadd.f32 %v1000_v52, %v881_v49  ;;  %v1198_v52 = vld [vmem:[#allocation11 + $0x1f8] sm:$0xff] }
 0x224   :  { %v1002_v54 = vpop.f32.mrf.mxu0 }
 0x225   :  { %v1007_v55 = vmul.f32 0.5, %v1001_v53  ;;  %1846 = vst [vmem:[#allocation14 + $0x8] sm:$0xff] %v1001_v53  ;;  %v1003_v56 = vadd.f32 %v1002_v54, %v877_v48  ;;  %v1197_v48 = vld [vmem:[#allocation11 + $0x1f0] sm:$0xff] }
 0x226   :  { %v1004_v57 = vpop.f32.mrf.mxu0  ;;  %v2043_v50 = vcombine.low %v1193_v46, %v1197_v48 }
 0x227   :  { %v1009_v58 = vmul.f32 1.442695, %v1007_v55  ;;  %1847 = vst [vmem:[#allocation14 + $0x10] sm:$0xff] %v1003_v56  ;;  %v1005_v59 = vadd.f32 %v1004_v57, %v881_v49  ;;  %v1194_v49 = vld [vmem:[#allocation11 + $0x1d8] sm:$0xff]  ;;  %v1974_v55 = vld [vmem:[%s2720_s7] ss:$0 sm:$0xff] }
 0x228   :  { %v2045_v53 = vcombine.low %v1194_v49, %v1198_v52  ;;  %v2046_v54 = vcombine.high %v1194_v49, %v1198_v52  ;;  %v1138_v52 = vld [vmem:[#allocation11 + $0x18] sm:$0xff]  ;;  %s2551_s7 = smov [#allocation14]  }
 0x229   :  { %2296 = vpow2.f32 %v1009_v58  ;;  %v1008_v60 = vmul.f32 0.5, %v1005_v59  ;;  %1848 = vst [vmem:[#allocation14 + $0x18] sm:$0xff] %v1005_v59  ;;  %s1866_s1 = sshll.u32 %s2551_s7, 4  ;;  %s1867_s1 = int_to_ptr.vmem [resolvable:$true] %s1866_s1 }
 0x22a   :  { %s2484_s13 = scalar_lea.vmem %s1867_s1, 512  ;;  %p2489_p3 = scmp.lt.s32.totalorder %s1867_s1, %s1867_s1 }
 0x22b   :  { %v1011_v61 = vmul.f32 1.442695, %v1008_v60  ;;  %p2485_p2 = scmp.ne.s32.totalorder %s1867_s1, %s2484_s13  ;;  %p2490_p4 = scmp.lt.s32.totalorder %s2484_s13, %s2484_s13 }
 0x22d   :  { %2298 = vpow2.f32 %v1011_v61  ;;  %v1185_v61 = vld [vmem:[#allocation11 + $0x190] sm:$0xff]  ;;  %p2491_p5 = por %p2490_p4, %p2489_p3 }
 0x22f   :  { %p2492_p6 = pnand %p2491_p5, %p2485_p2 }
 0x236   :  { %v2297_v62 = vpop.eup %2296 }
 0x237   :  { %v1015_v1 = vmul.f32 %v2297_v62, %v1013_v63  ;;  %v1189_v63 = vld [vmem:[#allocation11 + $0x1b0] sm:$0xff] }
 0x238   :  { %v2036_v5 = vcombine.high %v1185_v61, %v1189_v63  ;;  %v2035_v11 = vcombine.low %v1185_v61, %v1189_v63 }
 0x239   :  { %v1017_v6 = vadd.f32 %v1015_v1, %v999_v51  ;;  %v2044_v51 = vcombine.high %v1193_v46, %v1197_v48  ;;  %v1190_v1 = vld [vmem:[#allocation11 + $0x1b8] sm:$0xff]  ;;  %v1996_v48 = vcombine.high %v1145_v39, %v1149_v40 }
 0x23a   :  { %v2299_v2 = vpop.eup %2298 }
 0x23b   :  { %v1016_v3 = vmul.f32 %v2299_v2, %v1014_v0  ;;  %1647 = vmatprep.subr.bf16.mxu0 %v2044_v51  ;;  %v1186_v0 = vld [vmem:[#allocation11 + $0x198] sm:$0xff]  ;;  %v1141_v51 = vld [vmem:[#allocation11 + $0x30] sm:$0xff] }
 0x23d   :  { %v1018_v7 = vadd.f32 %v1016_v3, %v1003_v56 }
 0x23f   :  { %v1019_v8 = vpack.c.bf16 %v1018_v7, %v1017_v6  ;;  %v2038_v6 = vcombine.high %v1186_v0, %v1190_v1  ;;  %v1177_v7 = vld [vmem:[#allocation11 + $0x150] sm:$0xff] }
 0x241   :  { %2177 = vmatmul.mubr.bf16.vlgmr.msra.gmra.mxu1 %v1019_v8  ;;  %v1181_v8 = vld [vmem:[#allocation11 + $0x170] sm:$0xff] }
 0x242   :  { %1605 = vmatpush1.bf16.msra.mxu1 %v2041_v22  ;;  %1636 = vmatprep.mubr.bf16.mxu1 %v2548_v32  ;;  %v2002_v22 = vcombine.high %v1152_v25, %v1156_v16  ;;  %v2027_v21 = vcombine.low %v1177_v7, %v1181_v8  ;;  %v1161_v16 = vld [vmem:[#allocation11 + $0xd0] sm:$0xff] }
 0x243   :  { %1606 = vmatprep.subr.bf16.mxu1 %v2034_v9  ;;  %v1178_v9 = vld [vmem:[#allocation11 + $0x158] sm:$0xff] }
 0x244   :  { %v2030_v14 = vcombine.high %v1178_v9, %v1182_v10 }
 0x246   :  { %1607 = vmatpush1.bf16.msra.mxu1 %v2033_v12  ;;  %v2037_v12 = vcombine.low %v1186_v0, %v1190_v1 }
 0x247   :  { %1608 = vmatprep.subr.bf16.mxu1 %v2026_v13  ;;  %v2028_v13 = vcombine.high %v1177_v7, %v1181_v8 }
 0x24a   :  { %1609 = vmatpush1.bf16.msra.mxu1 %v2025_v17  ;;  %v1173_v17 = vld [vmem:[#allocation11 + $0x130] sm:$0xff] }
 0x24b   :  { %1610 = vmatprep.subr.bf16.mxu1 %v2018_v18  ;;  %v1170_v18 = vld [vmem:[#allocation11 + $0x118] sm:$0xff]  ;;  %v2019_v27 = vcombine.low %v1169_v15, %v1173_v17 }
 0x24c   :  { %v2022_v25 = vcombine.high %v1170_v18, %v1174_v20  ;;  %v2021_v28 = vcombine.low %v1170_v18, %v1174_v20 }
 0x24e   :  { %1611 = vmatpush1.bf16.msra.mxu1 %v2017_v23  ;;  %v2029_v23 = vcombine.low %v1178_v9, %v1182_v10 }
 0x24f   :  { %1612 = vmatprep.subr.bf16.mxu1 %v2010_v24  ;;  %v2020_v24 = vcombine.high %v1169_v15, %v1173_v17 }
 0x252   :  { %1613 = vmatpush1.bf16.msra.mxu1 %v2009_v19  ;;  %v1165_v19 = vld [vmem:[#allocation11 + $0xf0] sm:$0xff] }
 0x253   :  { %1614 = vmatprep.subr.bf16.mxu1 %v2002_v22  ;;  %v1162_v22 = vld [vmem:[#allocation11 + $0xd8] sm:$0xff]  ;;  %v2012_v29 = vcombine.high %v1161_v16, %v1165_v19 }
 0x256   :  { %1615 = vmatpush1.bf16.msra.mxu1 %v2001_v26  ;;  %v1166_v26 = vld [vmem:[#allocation11 + $0xf8] sm:$0xff] }
 0x257   :  { %1616 = vmatprep.subr.bf16.mxu1 %v1994_v35  ;;  %v2011_v35 = vcombine.low %v1161_v16, %v1165_v19  ;;  %v2013_v36 = vcombine.low %v1162_v22, %v1166_v26 }
 0x25a   :  { %1617 = vmatpush1.bf16.msra.mxu1 %v1993_v34  ;;  %v1158_v34 = vld [vmem:[#allocation11 + $0xb8] sm:$0xff] }
 0x25b   :  { %1618 = vmatprep.subr.bf16.mxu1 %v1986_v43  ;;  %v2006_v38 = vcombine.high %v1154_v33, %v1158_v34  ;;  %v2003_v43 = vcombine.low %v1153_v30, %v1157_v31  ;;  %v2005_v46 = vcombine.low %v1154_v33, %v1158_v34 }
 0x25e   :  { %1619 = vmatpush1.bf16.msra.mxu1 %v1985_v42  ;;  %v1150_v42 = vld [vmem:[#allocation11 + $0x78] sm:$0xff] }
 0x25f   :  { %1690 = vmatprep.subr.bf16.mxu1 %v2046_v54  ;;  %v1998_v49 = vcombine.high %v1146_v41, %v1150_v42  ;;  %v1995_v54 = vcombine.low %v1145_v39, %v1149_v40 }
 0x301   :  { %v1125_v56 = vpop.f32.mrf.mxu1 }
 0x302   :  { %v1126_v58 = vadd.f32 %v1974_v55, %v1125_v56 }
 0x303   :  { %v2178_v57 = vpop.f32.mrf.mxu1 }
 0x304   :  { %v1132_v2 = vmax.f32 %v1126_v58, 0.0 }
 0x305   :  { %v1128_v59 = vpop.f32.mrf.mxu1 }
 0x306   :  { %v1129_v60 = vadd.f32 %v1974_v55, %v1128_v59  ;;  %v1997_v55 = vcombine.low %v1146_v41, %v1150_v42 }
 0x307   :  { %v2179_v62 = vpop.f32.mrf.mxu1 }
 0x308   :  { %v1133_v3 = vmax.f32 %v1129_v60, 0.0 }
 0x30a   :  { %v2675_v4 = vpack.c.bf16 %v1133_v3, %v1132_v2 }
 0x30c   :  { %1594 = vmatmul.mubr.bf16.vlgmr.msra.gmra.mxu0 %v2675_v4  ;;  %1637 = vmatmul.mubr.bf16.vlgmr.msra.gmra.mxu1 %v2675_v4 }
 0x30d   :  { %1648 = vmatpush1.bf16.msra.mxu0 %v2043_v50  ;;  %1691 = vmatpush1.bf16.msra.mxu1 %v2045_v53  ;;  %v1137_v50 = vld [vmem:[#allocation11 + $0x10] sm:$0xff]  ;;  %v1142_v53 = vld [vmem:[#allocation11 + $0x38] sm:$0xff] }
 0x30e   :  { %1649 = vmatprep.subr.bf16.mxu0 %v2036_v5  ;;  %1692 = vmatprep.subr.bf16.mxu1 %v2038_v6  ;;  %v1988_v56 = vcombine.high %v1137_v50, %v1141_v51  ;;  %v1990_v57 = vcombine.high %v1138_v52, %v1142_v53  ;;  %v1987_v58 = vcombine.low %v1137_v50, %v1141_v51 }
 0x30f   :  { %1679 = vmatprep.mubr.bf16.mxu0 %v2548_v32  ;;  %1722 = vmatprep.mubr.bf16.mxu1 %v2548_v32  ;;  %v2014_v32 = vcombine.high %v1162_v22, %v1166_v26  ;;  %v1989_v59 = vcombine.low %v1138_v52, %v1142_v53 }
 0x311   :  { %1650 = vmatpush1.bf16.msra.mxu0 %v2035_v11  ;;  %1693 = vmatpush1.bf16.msra.mxu1 %v2037_v12 }
 0x312   :  { %1651 = vmatprep.subr.bf16.mxu0 %v2028_v13  ;;  %1694 = vmatprep.subr.bf16.mxu1 %v2030_v14 }
 0x315   :  { %1652 = vmatpush1.bf16.msra.mxu0 %v2027_v21  ;;  %1695 = vmatpush1.bf16.msra.mxu1 %v2029_v23 }
 0x316   :  { %1653 = vmatprep.subr.bf16.mxu0 %v2020_v24  ;;  %1696 = vmatprep.subr.bf16.mxu1 %v2022_v25 }
 0x319   :  { %1654 = vmatpush1.bf16.msra.mxu0 %v2019_v27  ;;  %1697 = vmatpush1.bf16.msra.mxu1 %v2021_v28 }
 0x31a   :  { %1655 = vmatprep.subr.bf16.mxu0 %v2012_v29  ;;  %1698 = vmatprep.subr.bf16.mxu1 %v2014_v32 }
 0x31d   :  { %1656 = vmatpush1.bf16.msra.mxu0 %v2011_v35  ;;  %1699 = vmatpush1.bf16.msra.mxu1 %v2013_v36 }
 0x31e   :  { %1657 = vmatprep.subr.bf16.mxu0 %v2004_v37  ;;  %1700 = vmatprep.subr.bf16.mxu1 %v2006_v38 }
 0x321   :  { %1658 = vmatpush1.bf16.msra.mxu0 %v2003_v43  ;;  %1701 = vmatpush1.bf16.msra.mxu1 %v2005_v46 }
 0x322   :  { %1659 = vmatprep.subr.bf16.mxu0 %v1996_v48  ;;  %1702 = vmatprep.subr.bf16.mxu1 %v1998_v49 }
 0x325   :  { %1660 = vmatpush1.bf16.msra.mxu0 %v1995_v54  ;;  %1703 = vmatpush1.bf16.msra.mxu1 %v1997_v55 }
 0x326   :  { %1661 = vmatprep.subr.bf16.mxu0 %v1988_v56  ;;  %1704 = vmatprep.subr.bf16.mxu1 %v1990_v57 }
 0x329   :  { %1662 = vmatpush1.bf16.msra.mxu0 %v1987_v58  ;;  %1705 = vmatpush1.bf16.msra.mxu1 %v1989_v59 }
 0x32c   :  { %1680 = vmatmul.mubr.bf16.vlgmr.msra.gmra.mxu0 %v2675_v4  ;;  %1723 = vmatmul.mubr.bf16.vlgmr.msra.gmra.mxu1 %v2675_v4 }
 0x32d   :  { %2495 = shalt.err (!%p2492_p6)
}
 0x32e   :  { %s2552_s14 = smov 256   ;;  %s2553_s15 = smov 16   ;;  %v1211_v60 = vsub.s32 2, %v2657_v44  ;;  %v2690_v61 = vld [vmem:[%s2722_s9] sm:$0xff]  ;;  %v1215_v62 = vsub.s32 3, %v2657_v44  ;;  %v1219_v40 = vsub.s32 4, %v2657_v44 }
 0x32f   :  { %1872 = dma.vmem_to_hbm [thread:$0]  %s1867_s1, 512, %s2724_s11, [#allocation15], %s2552_s14, %s2552_s14, %s2553_s15   ;;  %v1204_v63 = vrot.slane %v2690_v61, %v876_v45  ;;  %v1208_v1 = vrot.slane %v2690_v61, %v880_v47  ;;  %v1227_v41 = vsub.s32 6, %v2657_v44  ;;  %v1223_v43 = vsub.s32 5, %v2657_v44 }
 0x330   :  { %v1212_v0 = vrot.slane %v2690_v61, %v1211_v60  ;;  %v1216_v2 = vrot.slane %v2690_v61, %v1215_v62  ;;  %v1231_v46 = vsub.s32 7, %v2657_v44  ;;  %v1220_v48 = vrot.slane %v2690_v61, %v1219_v40  ;;  %s2554_s9 = smov [#allocation13]  }
 0x331   :  { %v1228_v49 = vrot.slane %v2690_v61, %v1227_v41  ;;  %v1224_v50 = vrot.slane %v2690_v61, %v1223_v43  ;;  %s1854_s11 = sshll.u32 %s2554_s9, 4  ;;  %s1855_s11 = int_to_ptr.vmem [resolvable:$true] %s1854_s11 }
 0x332   :  { %v1232_v51 = vrot.slane %v2690_v61, %v1231_v46  ;;  %s2504_s20 = scalar_lea.vmem %s1855_s11, 2048  ;;  %p2509_p8 = scmp.lt.s32.totalorder %s1855_s11, %s1855_s11 }
 0x333   :  { %p2505_p7 = scmp.ne.s32.totalorder %s1855_s11, %s2504_s20  ;;  %p2510_p9 = scmp.lt.s32.totalorder %s2504_s20, %s2504_s20 }
 0x335   :  { %p2511_p10 = por %p2510_p9, %p2509_p8 }
 0x337   :  { %p2512_p11 = pnand %p2511_p10, %p2505_p7 }
 0x3cc   :  { %v1595_v3 = vpop.f32.mrf.mxu0  ;;  %v1638_v4 = vpop.f32.mrf.mxu1 }
 0x3cd   :  { %v1596_v5 = vadd.f32 %v1595_v3, %v1204_v63  ;;  %v1639_v6 = vadd.f32 %v1638_v4, %v1212_v0 }
 0x3ce   :  { %v1597_v7 = vpop.f32.mrf.mxu0  ;;  %v1640_v8 = vpop.f32.mrf.mxu1 }
 0x3cf   :  { %v2047_v9 = vmul.f32 -1.442695, %v1596_v5  ;;  %v2049_v10 = vmul.f32 -1.442695, %v1639_v6  ;;  %v1598_v11 = vadd.f32 %v1597_v7, %v1208_v1  ;;  %v1641_v12 = vadd.f32 %v1640_v8, %v1216_v2 }
 0x3d0   :  { %v1599_v13 = vpop.f32.mrf.mxu0  ;;  %v1642_v45 = vpop.f32.mrf.mxu1 }
 0x3d1   :  { %2300 = vpow2.f32 %v2047_v9  ;;  %v2048_v14 = vmul.f32 -1.442695, %v1598_v11  ;;  %v2050_v15 = vmul.f32 -1.442695, %v1641_v12  ;;  %v1600_v17 = vadd.f32 %v1599_v13, %v1204_v63 }
 0x3d2   :  { %2302 = vpow2.f32 %v2049_v10  ;;  %v1643_v47 = vadd.f32 %v1642_v45, %v1212_v0  ;;  %v1601_v18 = vpop.f32.mrf.mxu0  ;;  %v1644_v20 = vpop.f32.mrf.mxu1 }
 0x3d3   :  { %2304 = vpow2.f32 %v2048_v14  ;;  %v2055_v21 = vmul.f32 -1.442695, %v1600_v17  ;;  %v1602_v23 = vadd.f32 %v1601_v18, %v1208_v1  ;;  %v1645_v24 = vadd.f32 %v1644_v20, %v1216_v2 }
 0x3d4   :  { %2306 = vpow2.f32 %v2050_v15  ;;  %v2057_v25 = vmul.f32 -1.442695, %v1643_v47 }
 0x3d5   :  { %2308 = vpow2.f32 %v2055_v21  ;;  %v2056_v16 = vmul.f32 -1.442695, %v1602_v23  ;;  %v2058_v19 = vmul.f32 -1.442695, %v1645_v24 }
 0x3d6   :  { %2310 = vpow2.f32 %v2057_v25 }
 0x3d7   :  { %2312 = vpow2.f32 %v2056_v16 }
 0x3d8   :  { %2314 = vpow2.f32 %v2058_v19 }
 0x3de   :  { %v2301_v22 = vpop.eup %2300 }
 0x3df   :  { %v2303_v26 = vpop.eup %2302  ;;  %v1781_v27 = vadd.f32 1.0, %v2301_v22 }
 0x3e0   :  { %v2305_v28 = vpop.eup %2304  ;;  %v1783_v29 = vadd.f32 1.0, %v2303_v26 }
 0x3e1   :  { %v2307_v32 = vpop.eup %2306  ;;  %2316 = vrcp.f32 %v1781_v27  ;;  %v1782_v30 = vadd.f32 1.0, %v2305_v28 }
 0x3e2   :  { %v2309_v31 = vpop.eup %2308  ;;  %2318 = vrcp.f32 %v1783_v29  ;;  %v1784_v33 = vadd.f32 1.0, %v2307_v32 }
 0x3e3   :  { %v2311_v34 = vpop.eup %2310  ;;  %2320 = vrcp.f32 %v1782_v30  ;;  %v1789_v35 = vadd.f32 1.0, %v2309_v31 }
 0x3e4   :  { %v2313_v36 = vpop.eup %2312  ;;  %2322 = vrcp.f32 %v1784_v33  ;;  %v1791_v37 = vadd.f32 1.0, %v2311_v34 }
 0x3e5   :  { %v2315_v38 = vpop.eup %2314  ;;  %2324 = vrcp.f32 %v1789_v35  ;;  %v1790_v39 = vadd.f32 1.0, %v2313_v36 }
 0x3e6   :  { %2326 = vrcp.f32 %v1791_v37  ;;  %v1792_v42 = vadd.f32 1.0, %v2315_v38 }
 0x3e7   :  { %2328 = vrcp.f32 %v1790_v39 }
 0x3e8   :  { %2330 = vrcp.f32 %v1792_v42 }
 0x3ec   :  { %v1681_v52 = vpop.f32.mrf.mxu0  ;;  %v1724_v53 = vpop.f32.mrf.mxu1 }
 0x3ed   :  { %v1682_v54 = vadd.f32 %v1681_v52, %v1220_v48  ;;  %v1725_v55 = vadd.f32 %v1724_v53, %v1228_v49 }
 0x3ee   :  { %v2317_v56 = vpop.eup %2316  ;;  %v1683_v57 = vpop.f32.mrf.mxu0 }
 0x3ef   :  { %v1726_v58 = vpop.f32.mrf.mxu1  ;;  %v2319_v59 = vpop.eup %2318  ;;  %1829 = vst [vmem:[#allocation13] sm:$0xff] %v2317_v56  ;;  %v2051_v60 = vmul.f32 -1.442695, %v1682_v54  ;;  %v2053_v44 = vmul.f32 -1.442695, %v1725_v55  ;;  %v1684_v62 = vadd.f32 %v1683_v57, %v1224_v50 }
 0x3f0   :  { %v1727_v63 = vadd.f32 %v1726_v58, %v1232_v51  ;;  %v2321_v0 = vpop.eup %2320  ;;  %1831 = vst [vmem:[#allocation13 + $0x10] sm:$0xff] %v2319_v59  ;;  %v1685_v1 = vpop.f32.mrf.mxu0 }
 0x3f1   :  { %v1728_v2 = vpop.f32.mrf.mxu1  ;;  %v2323_v3 = vpop.eup %2322  ;;  %1830 = vst [vmem:[#allocation13 + $0x8] sm:$0xff] %v2321_v0  ;;  %2332 = vpow2.f32 %v2051_v60  ;;  %v2052_v61 = vmul.f32 -1.442695, %v1684_v62  ;;  %v1686_v5 = vadd.f32 %v1685_v1, %v1220_v48 }
 0x3f2   :  { %v2054_v4 = vmul.f32 -1.442695, %v1727_v63  ;;  %v2325_v6 = vpop.eup %2324  ;;  %1832 = vst [vmem:[#allocation13 + $0x18] sm:$0xff] %v2323_v3  ;;  %2334 = vpow2.f32 %v2053_v44  ;;  %v1729_v7 = vadd.f32 %v1728_v2, %v1228_v49  ;;  %v1687_v8 = vpop.f32.mrf.mxu0 }
 0x3f3   :  { %v1730_v9 = vpop.f32.mrf.mxu1  ;;  %v2327_v10 = vpop.eup %2326  ;;  %1837 = vst [vmem:[#allocation13 + $0x40] sm:$0xff] %v2325_v6  ;;  %2336 = vpow2.f32 %v2052_v61  ;;  %v2059_v11 = vmul.f32 -1.442695, %v1686_v5  ;;  %v1688_v12 = vadd.f32 %v1687_v8, %v1224_v50 }
 0x3f4   :  { %v1731_v13 = vadd.f32 %v1730_v9, %v1232_v51  ;;  %v2329_v45 = vpop.eup %2328  ;;  %1839 = vst [vmem:[#allocation13 + $0x50] sm:$0xff] %v2327_v10  ;;  %2338 = vpow2.f32 %v2054_v4  ;;  %v2061_v14 = vmul.f32 -1.442695, %v1729_v7 }
 0x3f5   :  { %v2331_v15 = vpop.eup %2330  ;;  %1838 = vst [vmem:[#allocation13 + $0x48] sm:$0xff] %v2329_v45  ;;  %2340 = vpow2.f32 %v2059_v11  ;;  %v2060_v17 = vmul.f32 -1.442695, %v1688_v12 }
 0x3f6   :  { %v2062_v47 = vmul.f32 -1.442695, %v1731_v13  ;;  %1840 = vst [vmem:[#allocation13 + $0x58] sm:$0xff] %v2331_v15  ;;  %2342 = vpow2.f32 %v2061_v14 }
 0x3f7   :  { %2344 = vpow2.f32 %v2060_v17 }
 0x3f8   :  { %2346 = vpow2.f32 %v2062_v47 }
 0x3fe   :  { %v2333_v18 = vpop.eup %2332 }
 0x3ff   :  { %v2335_v20 = vpop.eup %2334  ;;  %v1785_v21 = vadd.f32 1.0, %v2333_v18 }
 0x400   :  { %v2337_v23 = vpop.eup %2336  ;;  %v1787_v24 = vadd.f32 1.0, %v2335_v20 }
 0x401   :  { %v2339_v25 = vpop.eup %2338  ;;  %2348 = vrcp.f32 %v1785_v21  ;;  %v1786_v16 = vadd.f32 1.0, %v2337_v23 }
 0x402   :  { %v2341_v19 = vpop.eup %2340  ;;  %2350 = vrcp.f32 %v1787_v24  ;;  %v1788_v22 = vadd.f32 1.0, %v2339_v25 }
 0x403   :  { %v2343_v26 = vpop.eup %2342  ;;  %2352 = vrcp.f32 %v1786_v16  ;;  %v1793_v27 = vadd.f32 1.0, %v2341_v19 }
 0x404   :  { %v2345_v28 = vpop.eup %2344  ;;  %2354 = vrcp.f32 %v1788_v22  ;;  %v1795_v29 = vadd.f32 1.0, %v2343_v26 }
 0x405   :  { %v2347_v32 = vpop.eup %2346  ;;  %2356 = vrcp.f32 %v1793_v27  ;;  %v1794_v30 = vadd.f32 1.0, %v2345_v28 }
 0x406   :  { %2358 = vrcp.f32 %v1795_v29  ;;  %v1796_v31 = vadd.f32 1.0, %v2347_v32 }
 0x407   :  { %2360 = vrcp.f32 %v1794_v30 }
 0x408   :  { %2362 = vrcp.f32 %v1796_v31 }
 0x40e   :  { %v2349_v33 = vpop.eup %2348 }
 0x40f   :  { %v2351_v34 = vpop.eup %2350  ;;  %1833 = vst [vmem:[#allocation13 + $0x20] sm:$0xff] %v2349_v33 }
 0x410   :  { %v2353_v35 = vpop.eup %2352  ;;  %1835 = vst [vmem:[#allocation13 + $0x30] sm:$0xff] %v2351_v34 }
 0x411   :  { %v2355_v36 = vpop.eup %2354  ;;  %1834 = vst [vmem:[#allocation13 + $0x28] sm:$0xff] %v2353_v35 }
 0x412   :  { %v2357_v37 = vpop.eup %2356  ;;  %1836 = vst [vmem:[#allocation13 + $0x38] sm:$0xff] %v2355_v36 }
 0x413   :  { %v2359_v38 = vpop.eup %2358  ;;  %1841 = vst [vmem:[#allocation13 + $0x60] sm:$0xff] %v2357_v37 }
 0x414   :  { %v2361_v39 = vpop.eup %2360  ;;  %1843 = vst [vmem:[#allocation13 + $0x70] sm:$0xff] %v2359_v38 }
 0x415   :  { %v2363_v40 = vpop.eup %2362  ;;  %1842 = vst [vmem:[#allocation13 + $0x68] sm:$0xff] %v2361_v39 }
 0x416   :  { %1844 = vst [vmem:[#allocation13 + $0x78] sm:$0xff] %v2363_v40 }
 0x417   :  { %2515 = shalt.err (!%p2512_p11)
}
 0x418   :  { %s2555_s21 = smov 1024  }
 0x419   :  { %1860 = dma.vmem_to_hbm [thread:$0]  %s1855_s11, 2048, %s2723_s10, [#allocation4], %s2555_s21, %s2555_s21, %s2544_s18  }
 0x41a   :  { %2532 = dma.done.wait [#allocation4], 2048  }
 0x41b   :  { %2533 = vsyncadd [#allocation4], 4294965248 }
 0x41c   :  { %2534 = dma.done.wait [#allocation15], 512  }
 0x41d   :  { %2535 = vsyncadd [#allocation15], 4294966784 }
 0x41e   :  { %1879 = vsyncpa [#allocation3], 1 }
 0x41f   :  { %1880 = vsyncpa [#allocation6], 1 }
 0x420   :  { %1881 = vsyncpa [#allocation9], 1 }
 0x421   :  { %1882 = vsyncpa [#allocation12], 1 }
 0x422   :  { %1883 = vsyncpa [#allocation4], 1 }
 0x423   :  { %1884 = vsyncpa [#allocation15], 1 }

</bundles_post_ra>
